<compile_context>
chip_gen: v5e
topology: v5e:2x2
jax: 0.10.0
libtpu: 0.0.40
codegen_flags: <defaults>
</compile_context>

<pallas_src>
import jax
import jax.numpy as jnp
from jax.experimental import pallas as pl
from jax.experimental.pallas import tpu as pltpu


_DEFAULT_TILE = 1024                       # rows per grid step (multiple of 8)
_VMEM_BUDGET_BYTES = 16 * 1024 * 1024      # keep double-buffered tiles well under the scoped limit


def _round_up(a, m):
    return ((a + m - 1) // m) * m


def _pick_tile(n_rows, d_in, d_out, requested):
    """Largest row tile (multiple of 8) covering n_rows that keeps the
    double-buffered x/out tiles inside a conservative VMEM budget."""
    # per-row VMEM footprint: Mosaic pads the lane (last) dim to 128
    row_bytes = 4 * (_round_up(d_in, 128) + _round_up(d_out, 128))
    vmem_cap = max(8, ((_VMEM_BUDGET_BYTES // (2 * row_bytes)) // 8) * 8)
    t = min(int(requested), vmem_cap, _round_up(n_rows, 8))
    return max(8, (t // 8) * 8)


def _pad_rows(x, n_pad):
    n = x.shape[0]
    if n_pad == n:
        return x
    return jnp.pad(x, ((0, n_pad - n), (0, 0)))


# ------------------------------ kernels ------------------------------

def _obj_kernel(x_ref, beta_ref, out_ref):
    # out = x @ beta computed as a row-scaled lane reduction (exact f32, no MXU needed).
    # Output is only (N, 1) so its store volume is negligible next to the x read.
    out_ref[...] = jnp.sum(x_ref[...] * beta_ref[...], axis=-1, keepdims=True)


def _emb_kernel(x_ref, beta_ref, w_ref, b_ref, out_ref):
    # fea_in  = x * beta  (== x @ diag(beta))
    # fea_out = ReLU(fea_in @ W + b)
    # (When the wrapper lane-packs P samples per row, w_ref holds the block-diagonal
    #  (P*D, P*E) weight and this code is unchanged.)
    fea_in = x_ref[...] * beta_ref[...]
    z = jnp.dot(fea_in, w_ref[...], preferred_element_type=jnp.float32)
    z = z + b_ref[...]
    out_ref[...] = jnp.maximum(z, 0.0).astype(out_ref.dtype)


# ------------------------------ wrappers ------------------------------

def _forward_obj(x, beta_row, tile_n):
    n, d = x.shape
    tile = _pick_tile(n, d, 1, tile_n)
    n_pad = _round_up(n, tile)
    xp = _pad_rows(x, n_pad)

    out = pl.pallas_call(
        _obj_kernel,
        out_shape=jax.ShapeDtypeStruct((n_pad, 1), jnp.float32),
        grid_spec=pltpu.PrefetchScalarGridSpec(
            num_scalar_prefetch=0,
            grid=(n_pad // tile,),
            in_specs=[
                pl.BlockSpec((tile, d), lambda i: (i, 0)),
                pl.BlockSpec((1, d), lambda i: (0, 0)),
            ],
            out_specs=pl.BlockSpec((tile, 1), lambda i: (i, 0)),
        ),
        compiler_params=pltpu.CompilerParams(
            dimension_semantics=("parallel",)),
    )(xp, beta_row)
    return out[:n]


def _forward_emb(x, beta_row, w, b_row, tile_n):
    n, d = x.shape
    e = w.shape[1]

    # Lane packing: put P samples side-by-side on the 128-lane axis so both the x tile
    # and the output tile are lane-dense (no masked vst.msk partial stores).
    p = 128 // d if (d < 128 and 128 % d == 0) else 1
    if p > 1:
        beta_p = jnp.tile(beta_row, (1, p))                      # (1, P*D)
        b_p = jnp.tile(b_row, (1, p))                            # (1, P*E)
        w_p = jnp.zeros((p * d, p * e), dtype=w.dtype)           # block-diagonal weight
        for k in range(p):
            w_p = w_p.at[k * d:(k + 1) * d, k * e:(k + 1) * e].set(w)
        dp, ep = p * d, p * e
    else:
        beta_p, b_p, w_p, dp, ep = beta_row, b_row, w, d, e

    rows = pl.cdiv(n, p)
    tile = _pick_tile(rows, dp, ep, tile_n)
    rows_pad = _round_up(rows, tile)
    n_pad = rows_pad * p

    xp = _pad_rows(x, n_pad).reshape(rows_pad, dp)

    out = pl.pallas_call(
        _emb_kernel,
        out_shape=jax.ShapeDtypeStruct((rows_pad, ep), jnp.float32),
        grid_spec=pltpu.PrefetchScalarGridSpec(
            num_scalar_prefetch=0,
            grid=(rows_pad // tile,),
            in_specs=[
                pl.BlockSpec((tile, dp), lambda i: (i, 0)),
                pl.BlockSpec((1, dp), lambda i: (0, 0)),
                pl.BlockSpec((dp, ep), lambda i: (0, 0)),
                pl.BlockSpec((1, ep), lambda i: (0, 0)),
            ],
            out_specs=pl.BlockSpec((tile, ep), lambda i: (i, 0)),
        ),
        compiler_params=pltpu.CompilerParams(
            dimension_semantics=("parallel",)),
    )(xp, beta_p, w_p, b_p)
    return out.reshape(n_pad, e)[:n]


def contrastive_sgl_forward(x, beta, w, b, obj, *, tile_n=_DEFAULT_TILE):
    """ContrastiveSGL.forward.

    x:    (N, D) f32
    beta: (D, 1) f32  (PyTorch parameter layout)
    w:    (D, E) f32  (nn.Linear weight, pre-transposed)
    b:    (E,)   f32
    """
    n, d = x.shape
    beta_row = beta.reshape(1, d)
    if obj:
        return _forward_obj(x, beta_row, tile_n)
    e = w.shape[1]
    return _forward_emb(x, beta_row, w, b.reshape(1, e), tile_n)


# TODO(synk): SupConLossPairNegMask / get_Lc_neg_mask, the L1/L21/Ls regularizer getters and the
# numpy graph-Laplacian setup (Gaussian_matrix, X_corr, calculate_graph_X) are host-side
# preprocessing / loss code, not part of forward(); they are not implemented as kernels.


if __name__ == "__main__":
    # Module construction: ContrastiveSGL(dim_in=31, dim_emb=32, ...) -> self.dim_in = 32
    dim_in_arg = 31
    D = dim_in_arg + 1      # 32
    E = 32                  # dim_emb
    N = 100                 # batch of samples (not a tile multiple -> exercises padding)

    key = jax.random.PRNGKey(0)
    kx, kb, kw, kbias = jax.random.split(key, 4)

    x = jax.random.normal(kx, (N, D), dtype=jnp.float32)
    # self.beta = nn.Parameter(torch.randn(dim_in, 1))
    beta = jax.random.normal(kb, (D, 1), dtype=jnp.float32)
    # nn.Linear(D, E): weight (E, D), bias (E,). We store the weight pre-transposed as (D, E).
    w_t = (jax.random.normal(kw, (E, D), dtype=jnp.float32) / jnp.sqrt(D)).T
    bias = jax.random.normal(kbias, (E,), dtype=jnp.float32) * 0.01

    ref_obj = x @ beta
    ref_emb = jnp.maximum((x * beta.reshape(1, D)) @ w_t + bias.reshape(1, E), 0.0)

    # obj=True branch: x @ beta
    out_obj = contrastive_sgl_forward(x, beta, w_t, bias, obj=True)
    jax.block_until_ready(out_obj)
    assert out_obj.shape == (N, 1)
    assert jnp.allclose(out_obj, ref_obj, atol=5e-4, rtol=5e-4)

    # obj=False branch (lane-packed path: P = 128 // 32 = 4 samples per 128-lane row)
    out_emb = contrastive_sgl_forward(x, beta, w_t, bias, obj=False)
    jax.block_until_ready(out_emb)
    assert out_emb.shape == (N, E)
    assert jnp.allclose(out_emb, ref_emb, atol=5e-4, rtol=5e-4)

    # multi-step grid + remainder handling with small explicit tiles
    out_obj2 = contrastive_sgl_forward(x, beta, w_t, bias, obj=True, tile_n=16)
    out_emb2 = contrastive_sgl_forward(x, beta, w_t, bias, obj=False, tile_n=8)
    jax.block_until_ready((out_obj2, out_emb2))
    assert jnp.allclose(out_obj2, ref_obj, atol=5e-4, rtol=5e-4)
    assert jnp.allclose(out_emb2, ref_emb, atol=5e-4, rtol=5e-4)

    # fallback (unpacked) emb path for feature dims that don't pack into 128 lanes
    D2, E2 = 40, 24
    x2 = jax.random.normal(kx, (N, D2), dtype=jnp.float32)
    beta2 = jax.random.normal(kb, (D2, 1), dtype=jnp.float32)
    w2 = (jax.random.normal(kw, (E2, D2), dtype=jnp.float32) / jnp.sqrt(D2)).T
    b2 = jax.random.normal(kbias, (E2,), dtype=jnp.float32) * 0.01
    ref2 = jnp.maximum((x2 * beta2.reshape(1, D2)) @ w2 + b2.reshape(1, E2), 0.0)
    out2 = contrastive_sgl_forward(x2, beta2, w2, b2, obj=False)
    jax.block_until_ready(out2)
    assert out2.shape == (N, E2)
    assert jnp.allclose(out2, ref2, atol=5e-4, rtol=5e-4)

    print("KERNEL_OK")
</pallas_src>

<mosaic_0001>
module attributes {stable_mosaic.version = 11 : i64} {
  func.func @_obj_kernel(%arg0: i32, %arg1: memref<104x32xf32, #tpu.memory_space<vmem>>, %arg2: memref<1x32xf32, #tpu.memory_space<vmem>>, %arg3: memref<104x1xf32, #tpu.memory_space<vmem>>) attributes {dimension_semantics = [#tpu.dimension_semantics<parallel>], iteration_bounds = array<i64: 1>, scalar_prefetch = 0 : i64, scratch_operands = 0 : i64, tpu.core_type = #tpu.core_type<tc>, window_params = [{transform_indices = @transform_0, window_bounds = array<i64: 104, 32>}, {pipeline_mode = #tpu.pipeline_mode<synchronous>, transform_indices = @transform_1, window_bounds = array<i64: 1, 32>}, {transform_indices = @transform_2, window_bounds = array<i64: 104, 1>}]} {
    %c0 = arith.constant 0 : index
    %c0_0 = arith.constant 0 : index
    %0 = vector.load %arg1[%c0, %c0_0] : memref<104x32xf32, #tpu.memory_space<vmem>>, vector<104x32xf32>
    %c0_1 = arith.constant 0 : index
    %c0_2 = arith.constant 0 : index
    %1 = vector.load %arg2[%c0_1, %c0_2] : memref<1x32xf32, #tpu.memory_space<vmem>>, vector<1x32xf32>
    %2 = vector.broadcast %1 : vector<1x32xf32> to vector<104x32xf32>
    %3 = arith.mulf %0, %2 : vector<104x32xf32>
    %cst = arith.constant dense<0.000000e+00> : vector<104xf32>
    %4 = vector.multi_reduction <add>, %3, %cst [1] : vector<104x32xf32> to vector<104xf32>
    %5 = vector.shape_cast %4 : vector<104xf32> to vector<104x1xf32>
    %c0_3 = arith.constant 0 : index
    %c0_4 = arith.constant 0 : index
    %6 = vector.load %arg3[%c0_3, %c0_4] : memref<104x1xf32, #tpu.memory_space<vmem>>, vector<104x1xf32>
    tpu.vector_store %arg3[%c0_3, %c0_4], %5 {strides = array<i32>} : memref<104x1xf32, #tpu.memory_space<vmem>>, vector<104x1xf32>,
    return
  }
  func.func @transform_0(%arg0: i32) -> (i32, i32) {
    %c0_i32 = arith.constant 0 : i32
    %c0_i32_0 = arith.constant 0 : i32
    return %arg0, %c0_i32 : i32, i32
  }
  func.func @transform_1(%arg0: i32) -> (i32, i32) {
    %c0_i32 = arith.constant 0 : i32
    %c0_i32_0 = arith.constant 0 : i32
    %c0_i32_1 = arith.constant 0 : i32
    return %c0_i32, %c0_i32_0 : i32, i32
  }
  func.func @transform_2(%arg0: i32) -> (i32, i32) {
    %c0_i32 = arith.constant 0 : i32
    %c0_i32_0 = arith.constant 0 : i32
    return %arg0, %c0_i32 : i32, i32
  }
}

</mosaic_0001>

<bundles_post_ra>
// kernel: tpu_custom_call.1
= control target key start
LH: loop header
LB: loop body
LE: loop exit
PB: predicated region body
PF: predicated region fallthrough
CT: control target
= control target key end

     0   :  { %vm41_vm0 = vcmask 261120   ;;  %vm81_vm1 = vcmask 7168   ;;  %s222_s0 = inlined_call_operand.vmem [shape: f32[104,32], index: 0, kind: input, shape index: {}]   ;;  %s223_s1 = inlined_call_operand.vmem [shape: f32[1,32], index: 1, kind: input, shape index: {}]   ;;  %s224_s2 = inlined_call_operand.vmem [shape: f32[104,1], index: 2, kind: output, shape index: {}]  }
   0x1   :  { %v11_v0 = vld [vmem:[%s222_s0] sm:$0xff]  ;;  %v13_v3 = vld [vmem:[%s222_s0 + $0x10] sm:$0xff]  ;;  %v12_v7 = vld [vmem:[%s222_s0 + $0x8] sm:$0xff] }
   0x2   :  { %v99_v1 = vld [vmem:[%s223_s1] ss:$0 sm:$0xff]  ;;  %v16_v8 = vld [vmem:[%s222_s0 + $0x28] sm:$0xff]  ;;  %v14_v12 = vld [vmem:[%s222_s0 + $0x18] sm:$0xff] }
   0x3   :  { %v15_v2 = vld [vmem:[%s222_s0 + $0x20] sm:$0xff]  ;;  %v28_v4 = vmul.f32 %v99_v1, %v11_v0  ;;  %v30_v6 = vmul.f32 %v99_v1, %v13_v3  ;;  %v29_v13 = vmul.f32 %v99_v1, %v12_v7  ;;  %v33_v14 = vmul.f32 %v99_v1, %v16_v8  ;;  %v17_v19 = vld [vmem:[%s222_s0 + $0x30] sm:$0xff]  ;;  %v18_v21 = vld [vmem:[%s222_s0 + $0x38] sm:$0xff] }
   0x4   :  { %v32_v5 = vmul.f32 %v99_v1, %v15_v2  ;;  %v31_v15 = vmul.f32 %v99_v1, %v14_v12  ;;  %v19_v20 = vld [vmem:[%s222_s0 + $0x40] sm:$0xff]  ;;  %v34_v22 = vmul.f32 %v99_v1, %v17_v19  ;;  %v35_v24 = vmul.f32 %v99_v1, %v18_v21  ;;  %v20_v28 = vld [vmem:[%s222_s0 + $0x48] sm:$0xff]  ;;  %v22_v29 = vld [vmem:[%s222_s0 + $0x58] sm:$0xff] }
   0x5   :  { %v42_v9 = vsel %vm41_vm0, %v28_v4, 0.0  ;;  %v48_v11 = vsel %vm41_vm0, %v30_v6, 0.0  ;;  %v45_v16 = vsel %vm41_vm0, %v29_v13, 0.0  ;;  %v57_v17 = vsel %vm41_vm0, %v33_v14, 0.0  ;;  %v21_v30 = vld [vmem:[%s222_s0 + $0x50] sm:$0xff]  ;;  %v23_v37 = vld [vmem:[%s222_s0 + $0x60] sm:$0xff] }
   0x6   :  { %v54_v10 = vsel %vm41_vm0, %v32_v5, 0.0  ;;  %43 = vadd.xlane.f32.xlu0 %v42_v9  ;;  %49 = vadd.xlane.f32.xlu1 %v48_v11  ;;  %v51_v18 = vsel %vm41_vm0, %v31_v15, 0.0  ;;  %v36_v23 = vmul.f32 %v99_v1, %v19_v20  ;;  %v60_v25 = vsel %vm41_vm0, %v34_v22, 0.0 }
   0x7   :  { %55 = vadd.xlane.f32.xlu2 %v54_v10  ;;  %v63_v27 = vsel %vm41_vm0, %v35_v24, 0.0  ;;  %v37_v31 = vmul.f32 %v99_v1, %v20_v28  ;;  %v39_v32 = vmul.f32 %v99_v1, %v22_v29  ;;  %v38_v33 = vmul.f32 %v99_v1, %v21_v30 }
   0x8   :  { %v66_v26 = vsel %vm41_vm0, %v36_v23, 0.0  ;;  %v40_v38 = vmul.f32 %v99_v1, %v23_v37 }
   0x9   :  { %v69_v34 = vsel %vm41_vm0, %v37_v31, 0.0  ;;  %v75_v35 = vsel %vm41_vm0, %v39_v32, 0.0  ;;  %v72_v36 = vsel %vm41_vm0, %v38_v33, 0.0 }
   0xa   :  { %v78_v39 = vsel %vm41_vm0, %v40_v38, 0.0 }
   0xe   :  { %46 = vadd.xlane.f32.xlu0 %v45_v16  ;;  %52 = vadd.xlane.f32.xlu1 %v51_v18 }
   0xf   :  { %58 = vadd.xlane.f32.xlu2 %v57_v17 }
  0x16   :  { %61 = vadd.xlane.f32.xlu0 %v60_v25  ;;  %64 = vadd.xlane.f32.xlu1 %v63_v27 }
  0x17   :  { %67 = vadd.xlane.f32.xlu2 %v66_v26 }
  0x1e   :  { %70 = vadd.xlane.f32.xlu0 %v69_v34  ;;  %73 = vadd.xlane.f32.xlu1 %v72_v36 }
  0x1f   :  { %76 = vadd.xlane.f32.xlu2 %v75_v35 }
  0x26   :  { %79 = vadd.xlane.f32.xlu0 %v78_v39 }
  0x79   :  { %v44_v40 = vpop.xlane.xlu0 %43  ;;  %v50_v42 = vpop.xlane.xlu1 %49 }
  0x7a   :  { %v56_v41 = vpop.xlane.xlu2 %55  ;;  %82 = vst.msk [vmem:[%s224_s2] sm:$0xff] %vm81_vm1, %v44_v40 }
  0x7b   :  { %86 = vst.msk [vmem:[%s224_s2 + $0x20] sm:$0xff] %vm81_vm1, %v56_v41 }
  0x7c   :  { %84 = vst.msk [vmem:[%s224_s2 + $0x10] sm:$0xff] %vm81_vm1, %v50_v42 }
  0x81   :  { %v47_v43 = vpop.xlane.xlu0 %46  ;;  %v53_v45 = vpop.xlane.xlu1 %52 }
  0x82   :  { %v59_v44 = vpop.xlane.xlu2 %58  ;;  %83 = vst.msk [vmem:[%s224_s2 + $0x8] sm:$0xff] %vm81_vm1, %v47_v43 }
  0x83   :  { %87 = vst.msk [vmem:[%s224_s2 + $0x28] sm:$0xff] %vm81_vm1, %v59_v44 }
  0x84   :  { %85 = vst.msk [vmem:[%s224_s2 + $0x18] sm:$0xff] %vm81_vm1, %v53_v45 }
  0x89   :  { %v62_v46 = vpop.xlane.xlu0 %61  ;;  %v65_v48 = vpop.xlane.xlu1 %64 }
  0x8a   :  { %v68_v47 = vpop.xlane.xlu2 %67  ;;  %88 = vst.msk [vmem:[%s224_s2 + $0x30] sm:$0xff] %vm81_vm1, %v62_v46 }
  0x8b   :  { %90 = vst.msk [vmem:[%s224_s2 + $0x40] sm:$0xff] %vm81_vm1, %v68_v47 }
  0x8c   :  { %89 = vst.msk [vmem:[%s224_s2 + $0x38] sm:$0xff] %vm81_vm1, %v65_v48 }
  0x91   :  { %v71_v49 = vpop.xlane.xlu0 %70  ;;  %v74_v51 = vpop.xlane.xlu1 %73 }
  0x92   :  { %v77_v50 = vpop.xlane.xlu2 %76  ;;  %91 = vst.msk [vmem:[%s224_s2 + $0x48] sm:$0xff] %vm81_vm1, %v71_v49 }
  0x93   :  { %93 = vst.msk [vmem:[%s224_s2 + $0x58] sm:$0xff] %vm81_vm1, %v77_v50 }
  0x94   :  { %92 = vst.msk [vmem:[%s224_s2 + $0x50] sm:$0xff] %vm81_vm1, %v74_v51 }
  0x99   :  { %v80_v52 = vpop.xlane.xlu0 %79 }
  0x9a   :  { %94 = vst.msk [vmem:[%s224_s2 + $0x60] sm:$0xff] %vm81_vm1, %v80_v52 }

</bundles_post_ra>
